<compile_context>
chip_gen: v7x
topology: tpu7x:2x2x1
jax: 0.10.0
libtpu: 0.0.40
codegen_flags: <defaults>
</compile_context>

<pallas_src>
import jax
import jax.numpy as jnp
from jax.experimental import pallas as pl
from jax.experimental.pallas import tpu as pltpu


def _mlm_loss_kernel(idx_ref,        # SMEM (m_pad,) int32 — compacted masked-row ids
                     tgt_logit_ref,  # VMEM (tn, 1) f32    — logit at the target token
                     valid_ref,      # VMEM (tn, 1) f32    — 1 real row / 0 padding
                     logits_hbm,     # ANY  (N, V)         — raw HBM logits
                     loss_ref,       # VMEM (tn, 1) f32    — per-row masked loss (out)
                     buf,            # VMEM (2, tn, V)     — gather double-buffer
                     copy_sem):      # DMA sem (2,)        — one per buffer slot
    tn = buf.shape[1]
    part = pl.program_id(0)          # megacore partition ("parallel")
    i = pl.program_id(1)             # row tile within the partition ("arbitrary")
    nsteps = pl.num_programs(1)

    def issue(tile, slot):
        base = tile * tn

        @pl.loop(0, tn)
        def _(r):
            row = idx_ref[base + r]
            pltpu.make_async_copy(
                logits_hbm.at[pl.ds(row, 1)],     # (1, V) row in HBM
                buf.at[slot, pl.ds(r, 1)],        # (1, V) row in VMEM
                copy_sem.at[slot],
            ).start()

    def wait_tile(slot):
        # Aggregate wait: each of the tn row copies increments copy_sem[slot]
        # by V*itemsize bytes on completion; one (tn, V)-shaped descriptor wait
        # therefore blocks until the whole tile is resident and drains the
        # semaphore — replaces tn serialized per-row waits.
        pltpu.make_async_copy(buf.at[slot], buf.at[slot], copy_sem.at[slot]).wait()

    @pl.when(i == 0)
    def _():
        issue(part * nsteps, 0)                  # prime the pipeline

    slot = i % 2

    # Prefetch the next tile BEFORE waiting on the current one: slot 1-slot was
    # fully consumed at step i-1, so overwriting it now is safe, and its DMAs
    # get the whole wait+compute window of this step to land.
    @pl.when(i + 1 < nsteps)
    def _():
        issue(part * nsteps + i + 1, 1 - slot)

    wait_tile(slot)                              # rows of tile i are resident

    x = buf[slot]                                # (tn, V), input dtype
    # Numerically-stable logsumexp: max/subtract in the input dtype (bf16 stays
    # packed on the VPU), exp/sum/log in f32.
    row_max = jnp.max(x, axis=-1, keepdims=True)
    shifted = (x - row_max).astype(jnp.float32)
    lse = (jnp.log(jnp.sum(jnp.exp(shifted), axis=-1, keepdims=True))
           + row_max.astype(jnp.float32))

    # Target logit was gathered in the wrapper — no full-width select pass here.
    loss_ref[...] = (lse - tgt_logit_ref[...]) * valid_ref[...]


def _round_up(x, m):
    return -(-x // m) * m


def mlm_loss(text_token_classifier_output, text_tokenized, masked_positions,
             *, max_masked=None, vmem_budget_bytes=None):
    """text_token_classifier_output: [B, T, V] float
       text_tokenized:               [B, T]    int
       masked_positions:             [B, T]    bool
       Returns scalar float32 MLM loss (NaN if nothing is masked, like torch).

       `max_masked`: static upper bound on the number of masked tokens; pass it
       when calling under jit so the kernel keeps its sparse masked-row gather.
    """
    B, T, V = text_token_classifier_output.shape
    N = B * T
    logits = text_token_classifier_output.reshape(N, V)
    tokens = text_tokenized.reshape(N).astype(jnp.int32)
    mask = masked_positions.reshape(N)

    count = jnp.count_nonzero(mask)

    # Static upper bound on the number of gathered rows.
    if max_masked is not None:
        m_upper = int(max_masked)
    else:
        try:
            m_upper = int(count)
        except jax.errors.ConcretizationTypeError:
            # TODO(synk): under jit pass max_masked explicitly (mask-ratio bound)
            # so the kernel does not fall back to gathering all N rows.
            m_upper = N
    m_upper = max(1, min(m_upper, N))

    # Generation-aware VMEM sizing (v7x: 64 MiB/TC, v5e/v6e: 128 MiB).
    try:
        vmem_cap = int(pltpu.get_tpu_info().vmem_capacity_bytes)
    except Exception:
        vmem_cap = 64 * 1024 * 1024
    vmem_limit = min((vmem_cap * 3) // 4, 100 * 1024 * 1024)
    if vmem_budget_bytes is None:
        vmem_budget_bytes = (vmem_limit * 3) // 4

    # Per gathered row: double-buffered input rows + ~3 f32 temporaries
    # (shifted / exp / reduce) materialized during the logsumexp.
    in_bytes = jnp.dtype(logits.dtype).itemsize
    per_row = 2 * V * in_bytes + 3 * V * 4
    tn = int(vmem_budget_bytes // per_row) // 8 * 8
    tn = max(8, min(512, tn))
    tn = min(tn, _round_up(m_upper, 8))

    num_tiles = pl.cdiv(m_upper, tn)
    num_parts = 2 if num_tiles >= 2 else 1        # v7x: one partition per TC
    tiles_per_part = pl.cdiv(num_tiles, num_parts)
    m_pad = num_parts * tiles_per_part * tn

    # Compacted masked-row indices, padded with row 0 / weight 0.
    idx = jnp.nonzero(mask, size=m_pad, fill_value=0)[0].astype(jnp.int32)
    valid = (jnp.arange(m_pad) < count).astype(jnp.float32).reshape(m_pad, 1)
    tgt = jnp.take(tokens, idx, axis=0)                       # (m_pad,)
    tgt_logit = logits[idx, tgt].astype(jnp.float32).reshape(m_pad, 1)

    per_row_loss = pl.pallas_call(
        _mlm_loss_kernel,
        out_shape=jax.ShapeDtypeStruct((m_pad, 1), jnp.float32),
        grid_spec=pltpu.PrefetchScalarGridSpec(
            num_scalar_prefetch=1,
            grid=(num_parts, tiles_per_part),
            in_specs=[
                pl.BlockSpec((tn, 1),
                             lambda p, i, idx_ref: (p * tiles_per_part + i, 0)),
                pl.BlockSpec((tn, 1),
                             lambda p, i, idx_ref: (p * tiles_per_part + i, 0)),
                pl.BlockSpec(memory_space=pl.ANY),            # logits stay in HBM
            ],
            out_specs=pl.BlockSpec((tn, 1),
                                   lambda p, i, idx_ref: (p * tiles_per_part + i, 0)),
            scratch_shapes=[
                pltpu.VMEM((2, tn, V), logits.dtype),         # gather double-buffer
                pltpu.SemaphoreType.DMA((2,)),                # one sem per slot
            ],
        ),
        compiler_params=pltpu.CompilerParams(
            dimension_semantics=("parallel", "arbitrary"),
            vmem_limit_bytes=int(vmem_limit),
        ),
    )(idx, tgt_logit, valid, logits)

    # Matches torch: masked sum / count_nonzero (0/0 -> NaN when nothing masked).
    return jnp.sum(per_row_loss) / count.astype(jnp.float32)


def _mlm_loss_ref(logits, targets, mask):
    """Pure-JAX reference for correctness checking."""
    B, T, V = logits.shape
    lg = logits.reshape(B * T, V).astype(jnp.float32)
    tg = targets.reshape(B * T).astype(jnp.int32)
    mk = mask.reshape(B * T).astype(jnp.float32)
    lse = jax.nn.logsumexp(lg, axis=-1)
    tgt_logit = jnp.take_along_axis(lg, tg[:, None], axis=-1)[:, 0]
    return jnp.sum((lse - tgt_logit) * mk) / jnp.sum(mk)


if __name__ == "__main__":
    key = jax.random.PRNGKey(0)

    # Test 1: tiny shape from the module spec (single tile, single partition).
    B, T, V = 2, 8, 128
    k1, k2, k3 = jax.random.split(key, 3)
    logits = jax.random.normal(k1, (B, T, V), dtype=jnp.float32)
    tokens = jax.random.randint(k2, (B, T), 0, V, dtype=jnp.int32)
    masked = jax.random.bernoulli(k3, p=0.3, shape=(B, T))
    masked = masked.at[0, 0].set(True)   # guarantee count_nonzero > 0

    loss = jax.block_until_ready(mlm_loss(logits, tokens, masked))
    ref = _mlm_loss_ref(logits, tokens, masked)
    assert jnp.allclose(loss, ref, atol=1e-4, rtol=1e-5), (loss, ref)

    # Test 2: larger shape with a small VMEM budget to force multiple gather
    # tiles, both partitions of the parallel axis, and cross-step
    # double-buffered prefetch + aggregate waits.
    B2, T2, V2 = 2, 256, 256
    k4, k5, k6 = jax.random.split(jax.random.PRNGKey(1), 3)
    logits2 = jax.random.normal(k4, (B2, T2, V2), dtype=jnp.float32)
    tokens2 = jax.random.randint(k5, (B2, T2), 0, V2, dtype=jnp.int32)
    masked2 = jax.random.bernoulli(k6, p=0.3, shape=(B2, T2))

    loss2 = jax.block_until_ready(
        mlm_loss(logits2, tokens2, masked2, vmem_budget_bytes=128 * 1024))
    ref2 = _mlm_loss_ref(logits2, tokens2, masked2)
    assert jnp.allclose(loss2, ref2, atol=1e-4, rtol=1e-5), (loss2, ref2)

    print("KERNEL_OK")
</pallas_src>

<mosaic_0001>
module attributes {stable_mosaic.version = 11 : i64} {
  func.func @_mlm_loss_kernel(%arg0: i32, %arg1: i32, %arg2: memref<8xi32, #tpu.memory_space<smem>>, %arg3: memref<8x1xf32, #tpu.memory_space<vmem>>, %arg4: memref<8x1xf32, #tpu.memory_space<vmem>>, %arg5: memref<16x128xf32, #tpu.memory_space<any>>, %arg6: memref<8x1xf32, #tpu.memory_space<vmem>>, %arg7: memref<2x8x128xf32, #tpu.memory_space<vmem>>, %arg8: memref<2x!tpu.dma_semaphore, #tpu.memory_space<semaphore_mem>>) attributes {dimension_semantics = [#tpu.dimension_semantics<parallel>, #tpu.dimension_semantics<arbitrary>], iteration_bounds = array<i64: 1, 1>, scalar_prefetch = 1 : i64, scratch_operands = 2 : i64, tpu.core_type = #tpu.core_type<tc>, window_params = [{transform_indices = @transform_0, window_bounds = array<i64: 8, 1>}, {transform_indices = @transform_1, window_bounds = array<i64: 8, 1>}, {}, {transform_indices = @transform_3, window_bounds = array<i64: 8, 1>}]} {
    %c0_i32 = arith.constant 0 : i32
    %0 = arith.cmpi eq, %arg1, %c0_i32 : i32
    %1 = arith.extui %0 : i1 to i32
    %c0_i32_0 = arith.constant 0 : i32
    %2 = arith.cmpi ne, %1, %c0_i32_0 : i32
    scf.if %2 {
      %c1_i32_20 = arith.constant 1 : i32
      %40 = arith.muli %arg0, %c1_i32_20 : i32
      %c8_i32 = arith.constant 8 : i32
      %41 = arith.muli %40, %c8_i32 : i32
      %c0_i32_21 = arith.constant 0 : i32
      %c8_i32_22 = arith.constant 8 : i32
      %42 = arith.addi %c0_i32_21, %c8_i32_22 : i32
      %c1_i32_23 = arith.constant 1 : i32
      scf.for %arg9 = %c0_i32_21 to %42 step %c1_i32_23  : i32 {
        %c1_i32_25 = arith.constant 1 : i32
        %43 = arith.muli %arg9, %c1_i32_25 : i32
        %c0_i32_26 = arith.constant 0 : i32
        %44 = arith.addi %c0_i32_26, %43 : i32
        %45 = arith.addi %41, %44 : i32
        %46 = arith.index_cast %45 : i32 to index
        %47 = memref.load %arg2[%46] : memref<8xi32, #tpu.memory_space<smem>>
        %c0_i32_27 = arith.constant 0 : i32
        %c0_i32_28 = arith.constant 0 : i32
        %c0_i32_29 = arith.constant 0 : i32
        %48 = tpu.memref_slice %arg5[%47, %c0_i32_29] : memref<16x128xf32, #tpu.memory_space<any>> -> memref<1x128xf32, #tpu.memory_space<any>>
        %c0_i32_30 = arith.constant 0 : i32
        %49 = tpu.memref_slice %arg7[%c0_i32_27, %44, %c0_i32_30] : memref<2x8x128xf32, #tpu.memory_space<vmem>> -> memref<1x1x128xf32, #tpu.memory_space<vmem>>
        %50 = tpu.memref_squeeze %49 : memref<1x1x128xf32, #tpu.memory_space<vmem>> -> memref<1x128xf32, #tpu.memory_space<vmem>>
        %51 = tpu.memref_slice %arg8[%c0_i32_28] : memref<2x!tpu.dma_semaphore, #tpu.memory_space<semaphore_mem>> -> memref<1x!tpu.dma_semaphore, #tpu.memory_space<semaphore_mem>>
        %52 = tpu.memref_squeeze %51 : memref<1x!tpu.dma_semaphore, #tpu.memory_space<semaphore_mem>> -> memref<!tpu.dma_semaphore, #tpu.memory_space<semaphore_mem>>
        tpu.enqueue_dma source(%48 : memref<1x128xf32, #tpu.memory_space<any>>) target(%50 : memref<1x128xf32, #tpu.memory_space<vmem>>) target_semaphore(%52 : memref<!tpu.dma_semaphore, #tpu.memory_space<semaphore_mem>>)
      }
      %c8_i32_24 = arith.constant 8 : i32
    } else {
    }
    %c2_i32 = arith.constant 2 : i32
    %c0_i32_1 = arith.constant 0 : i32
    %3 = arith.cmpi eq, %c2_i32, %c0_i32_1 : i32
    %c1_i32 = arith.constant 1 : i32
    %4 = arith.select %3, %c1_i32, %c2_i32 : i32
    %5 = arith.remsi %arg1, %4 : i32
    %c0_i32_2 = arith.constant 0 : i32
    %6 = arith.cmpi ne, %5, %c0_i32_2 : i32
    %c0_i32_3 = arith.constant 0 : i32
    %7 = arith.cmpi slt, %5, %c0_i32_3 : i32
    %c0_i32_4 = arith.constant 0 : i32
    %8 = arith.cmpi slt, %4, %c0_i32_4 : i32
    %9 = arith.xori %7, %8 : i1
    %10 = arith.andi %9, %6 : i1
    %11 = arith.addi %5, %4 : i32
    %12 = arith.select %10, %11, %5 : i32
    %c1_i32_5 = arith.constant 1 : i32
    %13 = arith.addi %arg1, %c1_i32_5 : i32
    %c1_i32_6 = arith.constant 1 : i32
    %14 = arith.cmpi slt, %13, %c1_i32_6 : i32
    %15 = arith.extui %14 : i1 to i32
    %c0_i32_7 = arith.constant 0 : i32
    %16 = arith.cmpi ne, %15, %c0_i32_7 : i32
    scf.if %16 {
      %c1_i32_20 = arith.constant 1 : i32
      %40 = arith.muli %arg0, %c1_i32_20 : i32
      %41 = arith.addi %40, %arg1 : i32
      %c1_i32_21 = arith.constant 1 : i32
      %42 = arith.addi %41, %c1_i32_21 : i32
      %c1_i32_22 = arith.constant 1 : i32
      %43 = arith.subi %c1_i32_22, %12 : i32
      %c8_i32 = arith.constant 8 : i32
      %44 = arith.muli %42, %c8_i32 : i32
      %c0_i32_23 = arith.constant 0 : i32
      %c8_i32_24 = arith.constant 8 : i32
      %45 = arith.addi %c0_i32_23, %c8_i32_24 : i32
      %c1_i32_25 = arith.constant 1 : i32
      scf.for %arg9 = %c0_i32_23 to %45 step %c1_i32_25  : i32 {
        %c1_i32_27 = arith.constant 1 : i32
        %46 = arith.muli %arg9, %c1_i32_27 : i32
        %c0_i32_28 = arith.constant 0 : i32
        %47 = arith.addi %c0_i32_28, %46 : i32
        %48 = arith.addi %44, %47 : i32
        %49 = arith.index_cast %48 : i32 to index
        %50 = memref.load %arg2[%49] : memref<8xi32, #tpu.memory_space<smem>>
        %c0_i32_29 = arith.constant 0 : i32
        %51 = tpu.memref_slice %arg5[%50, %c0_i32_29] : memref<16x128xf32, #tpu.memory_space<any>> -> memref<1x128xf32, #tpu.memory_space<any>>
        %c0_i32_30 = arith.constant 0 : i32
        %52 = tpu.memref_slice %arg7[%43, %47, %c0_i32_30] : memref<2x8x128xf32, #tpu.memory_space<vmem>> -> memref<1x1x128xf32, #tpu.memory_space<vmem>>
        %53 = tpu.memref_squeeze %52 : memref<1x1x128xf32, #tpu.memory_space<vmem>> -> memref<1x128xf32, #tpu.memory_space<vmem>>
        %54 = tpu.memref_slice %arg8[%43] : memref<2x!tpu.dma_semaphore, #tpu.memory_space<semaphore_mem>> -> memref<1x!tpu.dma_semaphore, #tpu.memory_space<semaphore_mem>>
        %55 = tpu.memref_squeeze %54 : memref<1x!tpu.dma_semaphore, #tpu.memory_space<semaphore_mem>> -> memref<!tpu.dma_semaphore, #tpu.memory_space<semaphore_mem>>
        tpu.enqueue_dma source(%51 : memref<1x128xf32, #tpu.memory_space<any>>) target(%53 : memref<1x128xf32, #tpu.memory_space<vmem>>) target_semaphore(%55 : memref<!tpu.dma_semaphore, #tpu.memory_space<semaphore_mem>>)
      }
      %c8_i32_26 = arith.constant 8 : i32
    } else {
    }
    %c0_i32_8 = arith.constant 0 : i32
    %c0_i32_9 = arith.constant 0 : i32
    %17 = tpu.memref_slice %arg7[%12, %c0_i32_8, %c0_i32_9] : memref<2x8x128xf32, #tpu.memory_space<vmem>> -> memref<1x8x128xf32, #tpu.memory_space<vmem>>
    %18 = tpu.memref_squeeze %17 : memref<1x8x128xf32, #tpu.memory_space<vmem>> -> memref<8x128xf32, #tpu.memory_space<vmem>>
    %c0_i32_10 = arith.constant 0 : i32
    %c0_i32_11 = arith.constant 0 : i32
    %19 = tpu.memref_slice %arg7[%12, %c0_i32_10, %c0_i32_11] : memref<2x8x128xf32, #tpu.memory_space<vmem>> -> memref<1x8x128xf32, #tpu.memory_space<vmem>>
    %20 = tpu.memref_squeeze %19 : memref<1x8x128xf32, #tpu.memory_space<vmem>> -> memref<8x128xf32, #tpu.memory_space<vmem>>
    %21 = tpu.memref_slice %arg8[%12] : memref<2x!tpu.dma_semaphore, #tpu.memory_space<semaphore_mem>> -> memref<1x!tpu.dma_semaphore, #tpu.memory_space<semaphore_mem>>
    %22 = tpu.memref_squeeze %21 : memref<1x!tpu.dma_semaphore, #tpu.memory_space<semaphore_mem>> -> memref<!tpu.dma_semaphore, #tpu.memory_space<semaphore_mem>>
    tpu.wait_dma2 semaphore(%22 : memref<!tpu.dma_semaphore, #tpu.memory_space<semaphore_mem>>) src(%18 : memref<8x128xf32, #tpu.memory_space<vmem>>) dst(%20 : memref<8x128xf32, #tpu.memory_space<vmem>>)
    %23 = arith.index_cast %12 : i32 to index
    %c0 = arith.constant 0 : index
    %c0_12 = arith.constant 0 : index
    %24 = vector.load %arg7[%23, %c0, %c0_12] : memref<2x8x128xf32, #tpu.memory_space<vmem>>, vector<1x8x128xf32>
    %25 = vector.shape_cast %24 : vector<1x8x128xf32> to vector<8x128xf32>
    %cst = arith.constant dense<0xFF800000> : vector<8xf32>
    %26 = vector.multi_reduction <maximumf>, %25, %cst [1] : vector<8x128xf32> to vector<8xf32>
    %27 = vector.shape_cast %26 : vector<8xf32> to vector<8x1xf32>
    %28 = vector.broadcast %27 : vector<8x1xf32> to vector<8x128xf32>
    %29 = arith.subf %25, %28 : vector<8x128xf32>
    %30 = math.exp %29 : vector<8x128xf32>
    %cst_13 = arith.constant dense<0.000000e+00> : vector<8xf32>
    %31 = vector.multi_reduction <add>, %30, %cst_13 [1] : vector<8x128xf32> to vector<8xf32>
    %32 = vector.shape_cast %31 : vector<8xf32> to vector<8x1xf32>
    %33 = math.log %32 : vector<8x1xf32>
    %34 = arith.addf %33, %27 : vector<8x1xf32>
    %c0_14 = arith.constant 0 : index
    %c0_15 = arith.constant 0 : index
    %35 = vector.load %arg3[%c0_14, %c0_15] : memref<8x1xf32, #tpu.memory_space<vmem>>, vector<8x1xf32>
    %36 = arith.subf %34, %35 : vector<8x1xf32>
    %c0_16 = arith.constant 0 : index
    %c0_17 = arith.constant 0 : index
    %37 = vector.load %arg4[%c0_16, %c0_17] : memref<8x1xf32, #tpu.memory_space<vmem>>, vector<8x1xf32>
    %38 = arith.mulf %36, %37 : vector<8x1xf32>
    %c0_18 = arith.constant 0 : index
    %c0_19 = arith.constant 0 : index
    %39 = vector.load %arg6[%c0_18, %c0_19] : memref<8x1xf32, #tpu.memory_space<vmem>>, vector<8x1xf32>
    tpu.vector_store %arg6[%c0_18, %c0_19], %38 {strides = array<i32>} : memref<8x1xf32, #tpu.memory_space<vmem>>, vector<8x1xf32>,
    return
  }
  func.func @transform_0(%arg0: i32, %arg1: i32, %arg2: memref<8xi32, #tpu.memory_space<smem>>) -> (i32, i32) {
    %c1_i32 = arith.constant 1 : i32
    %0 = arith.muli %arg0, %c1_i32 : i32
    %1 = arith.addi %0, %arg1 : i32
    %c0_i32 = arith.constant 0 : i32
    %c0_i32_0 = arith.constant 0 : i32
    return %1, %c0_i32 : i32, i32
  }
  func.func @transform_1(%arg0: i32, %arg1: i32, %arg2: memref<8xi32, #tpu.memory_space<smem>>) -> (i32, i32) {
    %c1_i32 = arith.constant 1 : i32
    %0 = arith.muli %arg0, %c1_i32 : i32
    %1 = arith.addi %0, %arg1 : i32
    %c0_i32 = arith.constant 0 : i32
    %c0_i32_0 = arith.constant 0 : i32
    return %1, %c0_i32 : i32, i32
  }
  func.func @transform_3(%arg0: i32, %arg1: i32, %arg2: memref<8xi32, #tpu.memory_space<smem>>) -> (i32, i32) {
    %c1_i32 = arith.constant 1 : i32
    %0 = arith.muli %arg0, %c1_i32 : i32
    %1 = arith.addi %0, %arg1 : i32
    %c0_i32 = arith.constant 0 : i32
    %c0_i32_0 = arith.constant 0 : i32
    return %1, %c0_i32 : i32, i32
  }
}

</mosaic_0001>

<bundles_post_ra>
// kernel: tpu_custom_call.1
= control target key start
LH: loop header
LB: loop body
LE: loop exit
PB: predicated region body
PF: predicated region fallthrough
CT: control target
= control target key end

     0   :  { %s393_s0 = inlined_call_operand.vmem [shape: s32[8], index: 0, kind: input, shape index: {}]   ;;  %s394_s1 = inlined_call_operand.vmem [shape: f32[8,1], index: 1, kind: input, shape index: {}]   ;;  %s395_s2 = inlined_call_operand.vmem [shape: f32[8,1], index: 2, kind: input, shape index: {}]   ;;  %s396_s3 = inlined_call_operand.vmem [shape: f32[16,128], index: 3, kind: input, shape index: {}]   ;;  %s397_s4 = inlined_call_operand.vmem [shape: f32[8,1], index: 4, kind: output, shape index: {}]  }
   0x1   :  { %s9_s17 = sshll.u32 %s393_s0, 4  ;;  %s10_s17 = int_to_ptr.vmem [resolvable:$true] %s9_s17 }
   0x2   :  { %s328_s18 = scalar_lea.vmem %s10_s17, 16  ;;  %p333_p1 = scmp.lt.s32.totalorder %s10_s17, %s10_s17 }
   0x3   :  { %p329_p0 = scmp.ne.s32.totalorder %s10_s17, %s328_s18  ;;  %p334_p2 = scmp.lt.s32.totalorder %s328_s18, %s328_s18 }
   0x5   :  { %p335_p3 = por %p334_p2, %p333_p1 }
   0x7   :  { %p336_p4 = pnand %p335_p3, %p329_p0 }
   0x9   :  { %339 = shalt.err (!%p336_p4)  }
   0xa   :  { %s352_s19 = smov [#allocation5]  }
   0xb   :  { %12 = dma.vmem_to_smem %s10_s17, 16, %s352_s19, [#allocation4] }
   0xc   :  { %344 = dma.done.wait [#allocation4], 16 }
   0xd   :  { %345 = vsyncadd [#allocation4], 4294967280 }
   0xe   :  { %14 = sfence }
   0xf   :  { %s348_s20 = smov 0  }
  0x10 LB: > { %s76_s21 = sld [smem:[#allocation5 + %s350_s20]]  ;;  %s78_s24 = scalar_lea.vmem [#allocation2], %s350_s20  ;;  %s350_s20 = sphi %s348_s20, %s74_s20  }
  0x16   : > { %s77_s23 = scalar_lea.vmem %s396_s3, %s76_s21 }
  0x17   : > { %v96_v0 = vld [vmem:[%s77_s23] sm:$0x1] }
  0x18   : > { %97 = vst [vmem:[%s78_s24] sm:$0x1] %v96_v0 }
  0x19   : > { %122 = vsyncadd [#allocation3], 16  ;;  %s74_s20 = sadd.s32 1, %s350_s20  }
  0x1a   : > { %p71_p5 = scmp.ge.s32.totalorder %s74_s20, 8  }
  0x1c   :  { %73 = sbr.rel (!%p71_p5) target bundleno = 16 (0x10), region = 148 }
  0x23   :  { %346 = dma.done.wait [#allocation3], 128 }
  0x24   :  { %347 = vsyncadd [#allocation3], 4294967168  ;;  %v203_v1 = vld [vmem:[#allocation2] sm:$0xff]  ;;  %vm218_vm0 = vcmask 7168  }
  0x25   :  { %204 = vmax.xlane.f32.xlu0 %v203_v1  ;;  %v214_v9 = vld [vmem:[%s394_s1] sm:$0xff] }
  0x26   :  { %v216_v11 = vld [vmem:[%s395_s2] sm:$0xff] }
  0xb2   :  { %v205_v2 = vpop.xlane.xlu0 %204 }
  0xb3   :  { %v206_v3 = vsub.f32 %v203_v1, %v205_v2 }
  0xb5   :  { %v207_v4 = vmul.f32 1.442695, %v206_v3 }
  0xb7   :  { %324 = vpow2.f32 %v207_v4 }
  0xc1   :  { %v325_v5 = vpop.eup %324 }
  0xc2   :  { %209 = vadd.xlane.f32.xlu0 %v325_v5 }
 0x14f   :  { %v210_v6 = vpop.xlane.xlu0 %209 }
 0x150   :  { %326 = vlog2.f32 %v210_v6 }
 0x15a   :  { %v327_v7 = vpop.eup %326 }
 0x15b   :  { %v212_v8 = vmul.f32 0.6931472, %v327_v7 }
 0x15d   :  { %v213_v10 = vadd.f32 %v212_v8, %v205_v2 }
 0x15f   :  { %v215_v12 = vsub.f32 %v213_v10, %v214_v9 }
 0x161   :  { %v217_v13 = vmul.f32 %v216_v11, %v215_v12 }
 0x163   :  { %219 = vst.msk [vmem:[%s397_s4] sm:$0xff] %vm218_vm0, %v217_v13 }
 0x164   :  { %235 = vsyncmov [#allocation3] }
 0x167   :  { %s236_s30 = vpop.sfrf %235 }
 0x168   :  { %p309_p6 = scmp.ne.s32.totalorder %s236_s30, 0 }
 0x16a   :  { %240 = shalt.err (%p309_p6)  }
 0x16b   :  { %242 = vsyncmov [#allocation3 + $0x1] }
 0x16e   :  { %s243_s5 = vpop.sfrf %242 }
 0x16f   :  { %p310_p7 = scmp.ne.s32.totalorder %s243_s5, 0 }
 0x171   :  { %247 = shalt.err (%p310_p7)  }

</bundles_post_ra>
